<compile_context>
chip_gen: v6e
topology: v6e:2x2x1
jax: 0.10.0
libtpu: 0.0.40
codegen_flags: <defaults>
</compile_context>

<pallas_src>
import functools

import jax
import jax.numpy as jnp
from jax.experimental import pallas as pl
from jax.experimental.pallas import tpu as pltpu


def _round_up(n, m):
    return ((n + m - 1) // m) * m


_INV_SQRT2 = 0.7071067811865476


def _prenorm_residual_kernel(x_ref, p_ref, b1_ref, w1_ref, w2_ref, o_ref,
                             xn_ref, acc_ref, *, eps, d_true):
    """One (tile, Dp) row block; grid axis 1 tiles the hidden dim of W1/W2.

    x_ref : (tile, Dp)  activations (input dtype)
    p_ref : (8, Dp)     fp32 rows = [gamma, beta, b2, 0, ...]
    b1_ref: (8, tn)     fp32, row 0 = b1 slice for this hidden block
    w1_ref: (Dp, tn)    bf16 column block of W1
    w2_ref: (tn, Dp)    bf16 row block of W2
    o_ref : (tile, Dp)  output (input dtype)
    xn_ref: (tile, Dp)  scratch: normalized activations cached in MXU dtype
    acc_ref:(tile, Dp)  scratch: fp32 accumulator of GELU(xn@W1)@W2 partials
    """
    j = pl.program_id(1)

    @pl.when(j == 0)
    def _init():
        xf = x_ref[...].astype(jnp.float32)
        inv_d = jnp.float32(1.0 / d_true)
        mean = jnp.sum(xf, axis=-1, keepdims=True) * inv_d
        xc = xf - mean
        if d_true != xf.shape[-1]:
            # Zero padded lanes so the two-pass variance stays exact.
            lane = jax.lax.broadcasted_iota(jnp.int32, xf.shape, 1)
            xc = jnp.where(lane < d_true, xc, jnp.float32(0.0))
        var = jnp.sum(xc * xc, axis=-1, keepdims=True) * inv_d
        gamma = p_ref[0:1, :]
        beta = p_ref[1:2, :]
        xn = xc * jax.lax.rsqrt(var + jnp.float32(eps)) * gamma + beta
        xn_ref[...] = xn.astype(xn_ref.dtype)        # padded lanes -> 0
        acc_ref[...] = jnp.zeros_like(acc_ref)

    # Partial MLP for this hidden block:  acc += GELU(xn @ W1_j + b1_j) @ W2_j
    h = jnp.dot(xn_ref[...], w1_ref[...], preferred_element_type=jnp.float32)
    h = h + b1_ref[0:1, :]
    # Exact (erf) GELU to match PyTorch's default nn.GELU.
    h = 0.5 * h * (1.0 + jax.lax.erf(h * jnp.float32(_INV_SQRT2)))
    acc_ref[...] += jnp.dot(h.astype(w2_ref.dtype), w2_ref[...],
                            preferred_element_type=jnp.float32)

    @pl.when(j == pl.num_programs(1) - 1)
    def _finalize():
        b2 = p_ref[2:3, :]
        # Re-read x for the residual instead of keeping an fp32 copy live
        # across both matmuls (less vreg/scratch pressure).
        xf = x_ref[...].astype(jnp.float32)
        o_ref[...] = (xf + acc_ref[...] + b2).astype(o_ref.dtype)


def _maybe_single_buffered(shape, index_map):
    """Constant-index block: request a single VMEM buffer when supported."""
    try:
        spec = pl.BlockSpec(shape, index_map,
                            pipeline_mode=pl.Buffered(buffer_count=1))
        return spec, 1
    except (TypeError, ValueError, AttributeError):
        # Older JAX: falls back to default double buffering (accounted below).
        return pl.BlockSpec(shape, index_map), 2


def prenorm_residual(x, gamma, beta, w1, b1, w2, b2, *, eps=1e-5,
                     tile_rows=512, mxu_dtype=jnp.bfloat16):
    """x: [B, S, D]; gamma/beta/b1/b2: [D]; w1/w2: [D, D] (y = x @ W + b).

    Matmul operands are fed to the MXU in `mxu_dtype` (default bfloat16) with
    fp32 accumulation; pass mxu_dtype=jnp.float32 for bit-faithful matmuls.
    """
    B, S, D = x.shape
    rows = B * S
    Dp = _round_up(D, 128)

    x_item = jnp.dtype(x.dtype).itemsize
    w_item = jnp.dtype(mxu_dtype).itemsize

    # ---- VMEM budget, clamped to this chip's physical capacity ----
    try:
        vmem_cap = int(pltpu.get_tpu_info().vmem_capacity_bytes)
    except Exception:
        vmem_cap = 64 << 20                 # conservative fallback (v7x per-TC)
    budget = vmem_cap - (6 << 20)           # headroom for Mosaic scratch

    def act_bytes(t):
        return (2 * t * Dp * x_item         # x tile, double-buffered
                + 2 * t * Dp * x_item       # out tile, double-buffered
                + t * Dp * w_item           # xn cache scratch
                + t * Dp * 4                # fp32 accumulator scratch
                + 4 * 8 * Dp * 4)           # params + b1 slabs (x2 buffers)

    # Row tile: multiple of 8; shrink while activations would crowd the weights.
    tile = _round_up(max(8, min(tile_rows, _round_up(rows, 8))), 8)
    while tile > 128 and act_bytes(tile) > budget // 2:
        tile = _round_up(max(128, tile // 2), 8)

    # Hidden tile: largest 128-multiple divisor of Dp whose double-buffered
    # W1/W2 slabs fit the remaining budget (tn == Dp -> fully resident weights).
    rem = max(budget - act_bytes(tile), 2 * 2 * Dp * 128 * w_item)
    m = Dp // 128
    max_mult = max(1, min(m, rem // (2 * 2 * Dp * 128 * w_item)))
    d_mult = 1
    for cand in range(int(max_mult), 0, -1):
        if m % cand == 0:
            d_mult = cand
            break
    tn = 128 * d_mult
    n_blocks = Dp // tn

    # ---- Host-side parameter prep (hoisted/cached once per weight set) ----
    x2 = x.reshape(rows, D)
    if Dp != D:
        x2 = jnp.pad(x2, ((0, 0), (0, Dp - D)))
        w1p = jnp.pad(w1, ((0, Dp - D), (0, Dp - D)))
        w2p = jnp.pad(w2, ((0, Dp - D), (0, Dp - D)))
    else:
        w1p, w2p = w1, w2
    w1p = w1p.astype(mxu_dtype)
    w2p = w2p.astype(mxu_dtype)

    params = jnp.zeros((8, Dp), jnp.float32)
    params = params.at[0, :D].set(gamma.astype(jnp.float32))
    params = params.at[1, :D].set(beta.astype(jnp.float32))
    params = params.at[2, :D].set(b2.astype(jnp.float32))
    b1v = jnp.zeros((8, Dp), jnp.float32).at[0, :D].set(b1.astype(jnp.float32))

    # ---- Block specs ----
    row_in_spec = pl.BlockSpec((tile, Dp), lambda i, j: (i, 0))
    row_out_spec = pl.BlockSpec((tile, Dp), lambda i, j: (i, 0))
    param_spec, _ = _maybe_single_buffered((8, Dp), lambda i, j: (0, 0))
    b1_spec = pl.BlockSpec((8, tn), lambda i, j: (0, j))
    if n_blocks == 1:
        w1_spec, wb1 = _maybe_single_buffered((Dp, tn), lambda i, j: (0, 0))
        w2_spec, wb2 = _maybe_single_buffered((tn, Dp), lambda i, j: (0, 0))
        wbuf = max(wb1, wb2)
    else:
        w1_spec = pl.BlockSpec((Dp, tn), lambda i, j: (0, j))
        w2_spec = pl.BlockSpec((tn, Dp), lambda i, j: (j, 0))
        wbuf = 2

    weight_bytes = wbuf * 2 * Dp * tn * w_item
    vmem_limit = int(min(vmem_cap,
                         max(act_bytes(tile) + weight_bytes + (8 << 20),
                             32 << 20)))

    grid = (pl.cdiv(rows, tile), n_blocks)

    out2 = pl.pallas_call(
        functools.partial(_prenorm_residual_kernel, eps=eps, d_true=D),
        out_shape=jax.ShapeDtypeStruct((rows, Dp), x.dtype),
        grid_spec=pltpu.PrefetchScalarGridSpec(
            num_scalar_prefetch=0,
            grid=grid,
            in_specs=[row_in_spec, param_spec, b1_spec, w1_spec, w2_spec],
            out_specs=row_out_spec,
            scratch_shapes=[pltpu.VMEM((tile, Dp), mxu_dtype),
                            pltpu.VMEM((tile, Dp), jnp.float32)]),
        compiler_params=pltpu.CompilerParams(
            dimension_semantics=("parallel", "arbitrary"),
            vmem_limit_bytes=vmem_limit),
    )(x2, params, b1v, w1p, w2p)

    out2 = out2[:, :D] if Dp != D else out2
    return out2.reshape(B, S, D)


def _reference(x, gamma, beta, w1, b1, w2, b2, eps=1e-5):
    mean = jnp.mean(x, axis=-1, keepdims=True)
    var = jnp.mean((x - mean) ** 2, axis=-1, keepdims=True)
    xn = (x - mean) / jnp.sqrt(var + eps) * gamma + beta
    h = xn @ w1 + b1
    h = jax.nn.gelu(h, approximate=False)
    return x + (h @ w2 + b2)


if __name__ == "__main__":
    B, S, D = 2, 8, 32
    key = jax.random.PRNGKey(0)
    kx, kw1, kb1, kw2, kb2 = jax.random.split(key, 5)

    x = jax.random.normal(kx, (B, S, D), dtype=jnp.float32)

    # Deterministic parameter init (synthetic; shapes match the PyTorch module).
    gamma = jnp.ones((D,), jnp.float32)           # nn.LayerNorm weight
    beta = jnp.zeros((D,), jnp.float32)           # nn.LayerNorm bias
    scale = 1.0 / jnp.sqrt(jnp.float32(D))
    w1 = jax.random.uniform(kw1, (D, D), jnp.float32, -scale, scale)
    b1 = jax.random.uniform(kb1, (D,), jnp.float32, -scale, scale)
    w2 = jax.random.uniform(kw2, (D, D), jnp.float32, -scale, scale)
    b2 = jax.random.uniform(kb2, (D,), jnp.float32, -scale, scale)

    out = prenorm_residual(x, gamma, beta, w1, b1, w2, b2)
    out = jax.block_until_ready(out)

    ref = _reference(x, gamma, beta, w1, b1, w2, b2)
    assert out.shape == (B, S, D)
    # bf16 MXU operands (weights + normalized activations) vs. pure-fp32
    # reference -> relaxed tolerance; kernel math itself is fp32-accumulated.
    assert jnp.allclose(out, ref, atol=5e-2, rtol=5e-2), float(
        jnp.max(jnp.abs(out - ref)))

    # TODO(synk): Dropout is a no-op at inference; training-mode stochastic
    # dropout (pltpu.prng_random_bits masking) is intentionally not implemented.
    print("KERNEL_OK")
</pallas_src>

<mosaic_0001>
module attributes {stable_mosaic.version = 11 : i64} {
  func.func @_prenorm_residual_kernel(%arg0: i32, %arg1: i32, %arg2: memref<16x128xf32, #tpu.memory_space<vmem>>, %arg3: memref<8x128xf32, #tpu.memory_space<vmem>>, %arg4: memref<8x128xf32, #tpu.memory_space<vmem>>, %arg5: memref<128x128xbf16, #tpu.memory_space<vmem>>, %arg6: memref<128x128xbf16, #tpu.memory_space<vmem>>, %arg7: memref<16x128xf32, #tpu.memory_space<vmem>>, %arg8: memref<16x128xbf16, #tpu.memory_space<vmem>>, %arg9: memref<16x128xf32, #tpu.memory_space<vmem>>) attributes {dimension_semantics = [#tpu.dimension_semantics<parallel>, #tpu.dimension_semantics<arbitrary>], iteration_bounds = array<i64: 1, 1>, scalar_prefetch = 0 : i64, scratch_operands = 2 : i64, tpu.core_type = #tpu.core_type<tc>, window_params = [{transform_indices = @transform_0, window_bounds = array<i64: 16, 128>}, {pipeline_mode = #tpu.pipeline_mode<synchronous>, transform_indices = @transform_1, window_bounds = array<i64: 8, 128>}, {transform_indices = @transform_2, window_bounds = array<i64: 8, 128>}, {pipeline_mode = #tpu.pipeline_mode<synchronous>, transform_indices = @transform_3, window_bounds = array<i64: 128, 128>}, {pipeline_mode = #tpu.pipeline_mode<synchronous>, transform_indices = @transform_4, window_bounds = array<i64: 128, 128>}, {transform_indices = @transform_5, window_bounds = array<i64: 16, 128>}]} {
    %c0_i32 = arith.constant 0 : i32
    %0 = arith.cmpi eq, %arg1, %c0_i32 : i32
    %1 = arith.extui %0 : i1 to i32
    %c0_i32_0 = arith.constant 0 : i32
    %2 = arith.cmpi ne, %1, %c0_i32_0 : i32
    scf.if %2 {
      %c0_18 = arith.constant 0 : index
      %c0_19 = arith.constant 0 : index
      %26 = vector.load %arg2[%c0_18, %c0_19] : memref<16x128xf32, #tpu.memory_space<vmem>>, vector<16x128xf32>
      %cst_20 = arith.constant dense<0.000000e+00> : vector<16xf32>
      %27 = vector.multi_reduction <add>, %26, %cst_20 [1] : vector<16x128xf32> to vector<16xf32>
      %28 = vector.shape_cast %27 : vector<16xf32> to vector<16x1xf32>
      %cst_21 = arith.constant 3.125000e-02 : f32
      %29 = vector.broadcast %cst_21 : f32 to vector<16x1xf32>
      %30 = arith.mulf %28, %29 : vector<16x1xf32>
      %31 = vector.broadcast %30 : vector<16x1xf32> to vector<16x128xf32>
      %32 = arith.subf %26, %31 : vector<16x128xf32>
      %33 = tpu.iota {dimensions = array<i32: 1>} : vector<16x128xi32>
      %c32_i32 = arith.constant 32 : i32
      %34 = vector.broadcast %c32_i32 : i32 to vector<16x128xi32>
      %35 = arith.cmpi slt, %33, %34 : vector<16x128xi32>
      %cst_22 = arith.constant 0.000000e+00 : f32
      %36 = vector.broadcast %cst_22 : f32 to vector<16x128xf32>
      %37 = arith.select %35, %32, %36 : vector<16x128xi1>, vector<16x128xf32>
      %38 = arith.mulf %37, %37 : vector<16x128xf32>
      %cst_23 = arith.constant dense<0.000000e+00> : vector<16xf32>
      %39 = vector.multi_reduction <add>, %38, %cst_23 [1] : vector<16x128xf32> to vector<16xf32>
      %40 = vector.shape_cast %39 : vector<16xf32> to vector<16x1xf32>
      %cst_24 = arith.constant 3.125000e-02 : f32
      %41 = vector.broadcast %cst_24 : f32 to vector<16x1xf32>
      %42 = arith.mulf %40, %41 : vector<16x1xf32>
      %c0_25 = arith.constant 0 : index
      %c0_26 = arith.constant 0 : index
      %43 = vector.load %arg3[%c0_25, %c0_26] : memref<8x128xf32, #tpu.memory_space<vmem>>, vector<1x128xf32>
      %c1 = arith.constant 1 : index
      %c0_27 = arith.constant 0 : index
      %44 = vector.load %arg3[%c1, %c0_27] : memref<8x128xf32, #tpu.memory_space<vmem>>, vector<1x128xf32>
      %cst_28 = arith.constant 9.99999974E-6 : f32
      %45 = vector.broadcast %cst_28 : f32 to vector<16x1xf32>
      %46 = arith.addf %42, %45 : vector<16x1xf32>
      %47 = math.rsqrt %46 : vector<16x1xf32>
      %48 = vector.broadcast %47 : vector<16x1xf32> to vector<16x128xf32>
      %49 = arith.mulf %37, %48 : vector<16x128xf32>
      %50 = vector.broadcast %43 : vector<1x128xf32> to vector<16x128xf32>
      %51 = arith.mulf %49, %50 : vector<16x128xf32>
      %52 = vector.broadcast %44 : vector<1x128xf32> to vector<16x128xf32>
      %53 = arith.addf %51, %52 : vector<16x128xf32>
      %54 = arith.truncf %53 : vector<16x128xf32> to vector<16x128xbf16>
      %c0_29 = arith.constant 0 : index
      %c0_30 = arith.constant 0 : index
      %55 = vector.load %arg8[%c0_29, %c0_30] : memref<16x128xbf16, #tpu.memory_space<vmem>>, vector<16x128xbf16>
      tpu.vector_store %arg8[%c0_29, %c0_30], %54 {strides = array<i32>} : memref<16x128xbf16, #tpu.memory_space<vmem>>, vector<16x128xbf16>,
      %cst_31 = arith.constant 0.000000e+00 : f32
      %56 = vector.broadcast %cst_31 : f32 to vector<16x128xf32>
      %c0_32 = arith.constant 0 : index
      %c0_33 = arith.constant 0 : index
      %57 = vector.load %arg9[%c0_32, %c0_33] : memref<16x128xf32, #tpu.memory_space<vmem>>, vector<16x128xf32>
      tpu.vector_store %arg9[%c0_32, %c0_33], %56 {strides = array<i32>} : memref<16x128xf32, #tpu.memory_space<vmem>>, vector<16x128xf32>,
    } else {
    }
    %c0 = arith.constant 0 : index
    %c0_1 = arith.constant 0 : index
    %3 = vector.load %arg8[%c0, %c0_1] : memref<16x128xbf16, #tpu.memory_space<vmem>>, vector<16x128xbf16>
    %c0_2 = arith.constant 0 : index
    %c0_3 = arith.constant 0 : index
    %4 = vector.load %arg5[%c0_2, %c0_3] : memref<128x128xbf16, #tpu.memory_space<vmem>>, vector<128x128xbf16>
    %cst = arith.constant dense<0.000000e+00> : vector<16x128xf32>
    %5 = tpu.matmul %3, %4, %cst {dimension_numbers = #tpu.dot_dimension_numbers<[1], [0], [0], [1], [0, 0, 1, 1], [], []>} : vector<16x128xbf16>, vector<128x128xbf16>, vector<16x128xf32> -> vector<16x128xf32>
    %c0_4 = arith.constant 0 : index
    %c0_5 = arith.constant 0 : index
    %6 = vector.load %arg4[%c0_4, %c0_5] : memref<8x128xf32, #tpu.memory_space<vmem>>, vector<1x128xf32>
    %7 = vector.broadcast %6 : vector<1x128xf32> to vector<16x128xf32>
    %8 = arith.addf %5, %7 : vector<16x128xf32>
    %cst_6 = arith.constant 5.000000e-01 : f32
    %9 = vector.broadcast %cst_6 : f32 to vector<16x128xf32>
    %10 = arith.mulf %9, %8 : vector<16x128xf32>
    %cst_7 = arith.constant 0.707106769 : f32
    %11 = vector.broadcast %cst_7 : f32 to vector<16x128xf32>
    %12 = arith.mulf %8, %11 : vector<16x128xf32>
    %13 = math.erf %12 : vector<16x128xf32>
    %cst_8 = arith.constant 1.000000e+00 : f32
    %14 = vector.broadcast %cst_8 : f32 to vector<16x128xf32>
    %15 = arith.addf %14, %13 : vector<16x128xf32>
    %16 = arith.mulf %10, %15 : vector<16x128xf32>
    %c0_9 = arith.constant 0 : index
    %c0_10 = arith.constant 0 : index
    %17 = vector.load %arg9[%c0_9, %c0_10] : memref<16x128xf32, #tpu.memory_space<vmem>>, vector<16x128xf32>
    %18 = arith.truncf %16 : vector<16x128xf32> to vector<16x128xbf16>
    %c0_11 = arith.constant 0 : index
    %c0_12 = arith.constant 0 : index
    %19 = vector.load %arg6[%c0_11, %c0_12] : memref<128x128xbf16, #tpu.memory_space<vmem>>, vector<128x128xbf16>
    %cst_13 = arith.constant dense<0.000000e+00> : vector<16x128xf32>
    %20 = tpu.matmul %18, %19, %cst_13 {dimension_numbers = #tpu.dot_dimension_numbers<[1], [0], [0], [1], [0, 0, 1, 1], [], []>} : vector<16x128xbf16>, vector<128x128xbf16>, vector<16x128xf32> -> vector<16x128xf32>
    %21 = arith.addf %17, %20 : vector<16x128xf32>
    %c0_14 = arith.constant 0 : index
    %c0_15 = arith.constant 0 : index
    %22 = vector.load %arg9[%c0_14, %c0_15] : memref<16x128xf32, #tpu.memory_space<vmem>>, vector<16x128xf32>
    tpu.vector_store %arg9[%c0_14, %c0_15], %21 {strides = array<i32>} : memref<16x128xf32, #tpu.memory_space<vmem>>, vector<16x128xf32>,
    %c0_i32_16 = arith.constant 0 : i32
    %23 = arith.cmpi eq, %arg1, %c0_i32_16 : i32
    %24 = arith.extui %23 : i1 to i32
    %c0_i32_17 = arith.constant 0 : i32
    %25 = arith.cmpi ne, %24, %c0_i32_17 : i32
    scf.if %25 {
      %c2 = arith.constant 2 : index
      %c0_18 = arith.constant 0 : index
      %26 = vector.load %arg3[%c2, %c0_18] : memref<8x128xf32, #tpu.memory_space<vmem>>, vector<1x128xf32>
      %c0_19 = arith.constant 0 : index
      %c0_20 = arith.constant 0 : index
      %27 = vector.load %arg2[%c0_19, %c0_20] : memref<16x128xf32, #tpu.memory_space<vmem>>, vector<16x128xf32>
      %c0_21 = arith.constant 0 : index
      %c0_22 = arith.constant 0 : index
      %28 = vector.load %arg9[%c0_21, %c0_22] : memref<16x128xf32, #tpu.memory_space<vmem>>, vector<16x128xf32>
      %29 = arith.addf %27, %28 : vector<16x128xf32>
      %30 = vector.broadcast %26 : vector<1x128xf32> to vector<16x128xf32>
      %31 = arith.addf %29, %30 : vector<16x128xf32>
      %c0_23 = arith.constant 0 : index
      %c0_24 = arith.constant 0 : index
      %32 = vector.load %arg7[%c0_23, %c0_24] : memref<16x128xf32, #tpu.memory_space<vmem>>, vector<16x128xf32>
      tpu.vector_store %arg7[%c0_23, %c0_24], %31 {strides = array<i32>} : memref<16x128xf32, #tpu.memory_space<vmem>>, vector<16x128xf32>,
    } else {
    }
    return
  }
  func.func @transform_0(%arg0: i32, %arg1: i32) -> (i32, i32) {
    %c0_i32 = arith.constant 0 : i32
    %c0_i32_0 = arith.constant 0 : i32
    return %arg0, %c0_i32 : i32, i32
  }
  func.func @transform_1(%arg0: i32, %arg1: i32) -> (i32, i32) {
    %c0_i32 = arith.constant 0 : i32
    %c0_i32_0 = arith.constant 0 : i32
    %c0_i32_1 = arith.constant 0 : i32
    return %c0_i32, %c0_i32_0 : i32, i32
  }
  func.func @transform_2(%arg0: i32, %arg1: i32) -> (i32, i32) {
    %c0_i32 = arith.constant 0 : i32
    %c0_i32_0 = arith.constant 0 : i32
    return %c0_i32, %arg1 : i32, i32
  }
  func.func @transform_3(%arg0: i32, %arg1: i32) -> (i32, i32) {
    %c0_i32 = arith.constant 0 : i32
    %c0_i32_0 = arith.constant 0 : i32
    %c0_i32_1 = arith.constant 0 : i32
    return %c0_i32, %c0_i32_0 : i32, i32
  }
  func.func @transform_4(%arg0: i32, %arg1: i32) -> (i32, i32) {
    %c0_i32 = arith.constant 0 : i32
    %c0_i32_0 = arith.constant 0 : i32
    %c0_i32_1 = arith.constant 0 : i32
    return %c0_i32, %c0_i32_0 : i32, i32
  }
  func.func @transform_5(%arg0: i32, %arg1: i32) -> (i32, i32) {
    %c0_i32 = arith.constant 0 : i32
    %c0_i32_0 = arith.constant 0 : i32
    return %arg0, %c0_i32 : i32, i32
  }
}

</mosaic_0001>

<bundles_post_ra>
// kernel: tpu_custom_call.1
= control target key start
LH: loop header
LB: loop body
LE: loop exit
PB: predicated region body
PF: predicated region fallthrough
CT: control target
= control target key end

     0   :  { %10 = vsyncpa [#allocation5], 0  ;;  %s775_s0 = inlined_call_operand.hbm [shape: f32[16,128], index: 0, kind: input, shape index: {}]   ;;  %s776_s1 = inlined_call_operand.hbm [shape: f32[8,128], index: 1, kind: input, shape index: {}]   ;;  %s777_s2 = inlined_call_operand.hbm [shape: f32[8,128], index: 2, kind: input, shape index: {}]   ;;  %s778_s3 = inlined_call_operand.hbm [shape: bf16[128,128], index: 3, kind: input, shape index: {}]   ;;  %s779_s4 = inlined_call_operand.hbm [shape: bf16[128,128], index: 4, kind: input, shape index: {}]   ;;  %s780_s5 = inlined_call_operand.hbm [shape: f32[16,128], index: 5, kind: output, shape index: {}]  }
   0x1   :  { %11 = vsyncpa [#allocation8], 0 }
   0x2   :  { %12 = vsyncpa [#allocation11], 0 }
   0x3   :  { %13 = vsyncpa [#allocation6], 0  ;;  %s675_s18 = smov [#allocation7]   ;;  %s676_s20 = smov [#allocation10]  }
   0x4   :  { %s32_s19 = sshll.u32 %s675_s18, 4  ;;  %s51_s21 = sshll.u32 %s676_s20, 4  ;;  %s33_s19 = int_to_ptr.vmem [resolvable:$true] %s32_s19  ;;  %s52_s21 = int_to_ptr.vmem [resolvable:$true] %s51_s21 }
   0x5   :  { %s555_s22 = scalar_lea.vmem %s33_s19, 128  ;;  %p560_p1 = scmp.lt.s32.totalorder %s33_s19, %s33_s19 }
   0x6   :  { %p556_p0 = scmp.ne.s32.totalorder %s33_s19, %s555_s22  ;;  %p561_p2 = scmp.lt.s32.totalorder %s555_s22, %s555_s22 }
   0x8   :  { %p562_p3 = por %p561_p2, %p560_p1 }
   0xa   :  { %p563_p4 = pnand %p562_p3, %p556_p0 }
   0xc   :  { %566 = shalt.err (!%p563_p4)
}
   0xd   :  { %35 = dma.hbm_to_vmem [thread:$0]  %s776_s1, 128, %s33_s19, [#allocation8]  }
   0xe   :  { %s575_s25 = scalar_lea.vmem %s52_s21, 1024  ;;  %p580_p6 = scmp.lt.s32.totalorder %s52_s21, %s52_s21 }
   0xf   :  { %p576_p5 = scmp.ne.s32.totalorder %s52_s21, %s575_s25  ;;  %p581_p7 = scmp.lt.s32.totalorder %s575_s25, %s575_s25 }
  0x11   :  { %p582_p8 = por %p581_p7, %p580_p6 }
  0x13   :  { %p583_p9 = pnand %p582_p8, %p576_p5 }
  0x15   :  { %586 = shalt.err (!%p583_p9)
}
  0x16   :  { %s677_s26 = smov 64   ;;  %s678_s27 = smov 4  }
  0x17   :  { %57 = dma.hbm_to_vmem [thread:$0]  %s778_s3, 1024, %s52_s21, [#allocation11], %s677_s26, %s677_s26, %s678_s27  }
  0x18   :  { %s679_s30 = smov [#allocation4]  }
  0x19   :  { %s19_s6 = sshll.u32 %s679_s30, 4  ;;  %s20_s6 = int_to_ptr.vmem [resolvable:$true] %s19_s6 }
  0x1a   :  { %s595_s1 = scalar_lea.vmem %s20_s6, 256  ;;  %p600_p11 = scmp.lt.s32.totalorder %s20_s6, %s20_s6 }
  0x1b   :  { %p596_p10 = scmp.ne.s32.totalorder %s20_s6, %s595_s1  ;;  %p601_p12 = scmp.lt.s32.totalorder %s595_s1, %s595_s1 }
  0x1d   :  { %p602_p13 = por %p601_p12, %p600_p11 }
  0x1f   :  { %p603_p0 = pnand %p602_p13, %p596_p10 }
  0x21   :  { %606 = shalt.err (!%p603_p0)
}
  0x22   :  { %s680_s7 = smov 128   ;;  %s681_s8 = smov 8  }
  0x23   :  { %25 = dma.hbm_to_vmem [thread:$0]  %s775_s0, 256, %s20_s6, [#allocation5], %s680_s7, %s680_s7, %s681_s8  }
  0x24   :  { %s682_s3 = smov [#allocation9]   ;;  %s683_s12 = smov [#allocation12]  }
  0x25   :  { %s42_s11 = sshll.u32 %s682_s3, 4  ;;  %s63_s13 = sshll.u32 %s683_s12, 4  ;;  %s43_s11 = int_to_ptr.vmem [resolvable:$true] %s42_s11  ;;  %s64_s13 = int_to_ptr.vmem [resolvable:$true] %s63_s13 }
  0x26   :  { %s615_s14 = scalar_lea.vmem %s43_s11, 128  ;;  %p620_p2 = scmp.lt.s32.totalorder %s43_s11, %s43_s11 }
  0x27   :  { %p616_p1 = scmp.ne.s32.totalorder %s43_s11, %s615_s14  ;;  %p621_p3 = scmp.lt.s32.totalorder %s615_s14, %s615_s14 }
  0x29   :  { %p622_p4 = por %p621_p3, %p620_p2 }
  0x2b   :  { %p623_p5 = pnand %p622_p4, %p616_p1 }
  0x2d   :  { %626 = shalt.err (!%p623_p5)
}
  0x2e   :  { %45 = dma.hbm_to_vmem [thread:$0]  %s777_s2, 128, %s43_s11, [#allocation8]  }
  0x2f   :  { %s635_s17 = scalar_lea.vmem %s64_s13, 1024  ;;  %p640_p7 = scmp.lt.s32.totalorder %s64_s13, %s64_s13 }
  0x30   :  { %p636_p6 = scmp.ne.s32.totalorder %s64_s13, %s635_s17  ;;  %p641_p8 = scmp.lt.s32.totalorder %s635_s17, %s635_s17 }
  0x32   :  { %p642_p9 = por %p641_p8, %p640_p7 }
  0x34   :  { %p643_p10 = pnand %p642_p9, %p636_p6 }
  0x36   :  { %646 = shalt.err (!%p643_p10)
}
  0x37   :  { %69 = dma.hbm_to_vmem [thread:$0]  %s779_s4, 1024, %s64_s13, [#allocation11], %s677_s26, %s677_s26, %s678_s27  }
  0x38   :  { %667 = dma.done.wait [#allocation5], 256  }
  0x39   :  { %668 = vsyncadd [#allocation5], 4294967040 }
  0x3a   :  { %669 = dma.done.wait [#allocation8], 256  }
  0x3b   :  { %670 = vsyncadd [#allocation8], 4294967040 }
  0x3c   :  { %671 = dma.done.wait [#allocation11], 2048  }
  0x3d   :  { %672 = vsyncadd [#allocation11], 4294965248  ;;  %v741_v0 = vld [vmem:[#allocation4] sm:$0xff]  ;;  %v743_v1 = vld [vmem:[#allocation4 + $0x8] sm:$0xff]  ;;  %v100_v2 = vlaneseq  ;;  %v684_v15 = vmov 0.0   ;;  %vm685_vm1 = vmmov 0  }
  0x3e   :  { %92 = vadd.xlane.f32.xlu0 %v741_v0  ;;  %v522_v14 = vld [vmem:[#allocation10 + $0x38] sm:$0xff]   ;;  %470 = vmatprep.subr.bf16.mxu0 %v684_v15  ;;  %v523_v16 = vld [vmem:[#allocation10 + $0x30] sm:$0xff]   ;;  %v524_v17 = vld [vmem:[#allocation10 + $0x28] sm:$0xff]   ;;  %s686_s2 = smov [#allocation13]  }
  0x3f   :  { %v101_v3 = vand.u32 127, %v100_v2  ;;  %490 = vmatprep.subr.bf16.mxu1 %v684_v15  ;;  %471 = vmatpush3.bf16.msra.mxu0 %v522_v14  ;;  %v525_v18 = vld [vmem:[#allocation10 + $0x20] sm:$0xff]   ;;  %v526_v19 = vld [vmem:[#allocation10 + $0x18] sm:$0xff]   ;;  %v527_v20 = vld [vmem:[#allocation10 + $0x10] sm:$0xff]   ;;  %s408_s4 = sshll.u32 %s686_s2, 4  ;;  %s409_s4 = int_to_ptr.vmem [resolvable:$true] %s408_s4 }
  0x40   :  { %472 = vmatprep.subr.bf16.mxu0 %v684_v15  ;;  %v528_v21 = vld [vmem:[#allocation10 + $0x8] sm:$0xff]   ;;  %486 = vmatprep.mubr.msk.bf16.mxu0 %vm685_vm1, %v684_v15  ;;  %v529_v22 = vld [vmem:[#allocation10] sm:$0xff]   ;;  %v531_v23 = vld [vmem:[#allocation12 + $0x38] sm:$0xff]   ;;  %s647_s19 = scalar_lea.vmem %s409_s4, 256  ;;  %p652_p12 = scmp.lt.s32.totalorder %s409_s4, %s409_s4 }
  0x41   :  { %vm102_vm0 = vcmp.lt.s32.totalorder %v101_v3, 32  ;;  %506 = vmatprep.mubr.msk.bf16.mxu1 %vm685_vm1, %v684_v15  ;;  %491 = vmatpush3.bf16.msra.mxu1 %v531_v23  ;;  %v422_v32 = vld [vmem:[#allocation7] ss:$0 sm:$0xff]  ;;  %v423_v36 = vld [vmem:[#allocation7 + $0x1] ss:$0 sm:$0xff]  ;;  %v533_v43 = vld [vmem:[#allocation12 + $0x28] sm:$0xff]   ;;  %p648_p11 = scmp.ne.s32.totalorder %s409_s4, %s647_s19  ;;  %p653_p13 = scmp.lt.s32.totalorder %s647_s19, %s647_s19 }
  0x42   :  { %94 = vadd.xlane.f32.xlu0 %v743_v1  ;;  %492 = vmatprep.subr.bf16.mxu1 %v684_v15  ;;  %v532_v42 = vld [vmem:[#allocation12 + $0x30] sm:$0xff]   ;;  %v534_v44 = vld [vmem:[#allocation12 + $0x20] sm:$0xff]   ;;  %v535_v45 = vld [vmem:[#allocation12 + $0x18] sm:$0xff]  }
  0x43   :  { %473 = vmatpush3.bf16.msra.mxu0 %v523_v16  ;;  %v536_v46 = vld [vmem:[#allocation12 + $0x10] sm:$0xff]   ;;  %v537_v47 = vld [vmem:[#allocation12 + $0x8] sm:$0xff]   ;;  %v538_v48 = vld [vmem:[#allocation12] sm:$0xff]   ;;  %p654_p0 = por %p653_p13, %p652_p12 }
  0x44   :  { %474 = vmatprep.subr.bf16.mxu0 %v684_v15  ;;  %v426_v49 = vld [vmem:[#allocation9] ss:$0 sm:$0xff] }
  0x45   :  { %493 = vmatpush3.bf16.msra.mxu1 %v532_v42  ;;  %p655_p1 = pnand %p654_p0, %p648_p11 }
  0x46   :  { %494 = vmatprep.subr.bf16.mxu1 %v684_v15 }
  0x47   :  { %475 = vmatpush3.bf16.msra.mxu0 %v524_v17 }
  0x48   :  { %476 = vmatprep.subr.bf16.mxu0 %v684_v15 }
  0x49   :  { %495 = vmatpush3.bf16.msra.mxu1 %v533_v43 }
  0x4a   :  { %496 = vmatprep.subr.bf16.mxu1 %v684_v15 }
  0x4b   :  { %477 = vmatpush3.bf16.msra.mxu0 %v525_v18 }
  0x4c   :  { %478 = vmatprep.subr.bf16.mxu0 %v684_v15 }
  0x4d   :  { %497 = vmatpush3.bf16.msra.mxu1 %v534_v44 }
  0x4e   :  { %498 = vmatprep.subr.bf16.mxu1 %v684_v15 }
  0x4f   :  { %479 = vmatpush3.bf16.msra.mxu0 %v526_v19 }
  0x50   :  { %480 = vmatprep.subr.bf16.mxu0 %v684_v15 }
  0x51   :  { %499 = vmatpush3.bf16.msra.mxu1 %v535_v45 }
  0x52   :  { %500 = vmatprep.subr.bf16.mxu1 %v684_v15 }
  0x53   :  { %481 = vmatpush3.bf16.msra.mxu0 %v527_v20 }
  0x54   :  { %482 = vmatprep.subr.bf16.mxu0 %v684_v15 }
  0x55   :  { %501 = vmatpush3.bf16.msra.mxu1 %v536_v46 }
  0x56   :  { %502 = vmatprep.subr.bf16.mxu1 %v684_v15 }
  0x57   :  { %483 = vmatpush3.bf16.msra.mxu0 %v528_v21 }
  0x58   :  { %484 = vmatprep.subr.bf16.mxu0 %v684_v15 }
  0x59   :  { %503 = vmatpush3.bf16.msra.mxu1 %v537_v47 }
  0x5a   :  { %504 = vmatprep.subr.bf16.mxu1 %v684_v15 }
  0x5b   :  { %485 = vmatpush3.bf16.msra.mxu0 %v529_v22 }
  0x5d   :  { %505 = vmatpush3.bf16.msra.mxu1 %v538_v48 }
  0xc7   :  { %v93_v4 = vpop.xlane.xlu0 %92 }
  0xc8   :  { %v96_v5 = vmul.f32 0.03125, %v93_v4 }
  0xca   :  { %v98_v6 = vsub.f32 %v741_v0, %v96_v5 }
  0xcb   :  { %v95_v7 = vpop.xlane.xlu0 %94 }
  0xcc   :  { %v97_v8 = vmul.f32 0.03125, %v95_v7  ;;  %v103_v9 = vsel %vm102_vm0, %v98_v6, 0.0  ;;  %v444_v6 = vld [vmem:[#allocation7 + $0x2] ss:$0 sm:$0xff] }
  0xcd   :  { %v105_v10 = vmul.f32 %v103_v9, %v103_v9 }
  0xce   :  { %v99_v11 = vsub.f32 %v743_v1, %v97_v8 }
  0xcf   :  { %107 = vadd.xlane.f32.xlu1 %v105_v10 }
  0xd0   :  { %v104_v12 = vsel %vm102_vm0, %v99_v11, 0.0 }
  0xd1   :  { %v106_v13 = vmul.f32 %v104_v12, %v104_v12 }
  0xd3   :  { %109 = vadd.xlane.f32.xlu1 %v106_v13 }
 0x158   :  { %v108_v24 = vpop.xlane.xlu1 %107 }
 0x159   :  { %v111_v25 = vmul.f32 0.03125, %v108_v24 }
 0x15b   :  { %v115_v26 = vadd.f32 1e-05, %v111_v25 }
 0x15c   :  { %v110_v27 = vpop.xlane.xlu1 %109 }
 0x15d   :  { %539 = vrsqrt.f32 %v115_v26  ;;  %v112_v28 = vmul.f32 0.03125, %v110_v27 }
 0x15f   :  { %v116_v29 = vadd.f32 1e-05, %v112_v28 }
 0x161   :  { %541 = vrsqrt.f32 %v116_v29 }
 0x16a   :  { %v540_v30 = vpop.eup %539 }
 0x16b   :  { %v119_v31 = vmul.f32 %v540_v30, %v103_v9 }
 0x16d   :  { %v125_v34 = vmul.f32 %v422_v32, %v119_v31 }
 0x16e   :  { %v542_v33 = vpop.eup %541 }
 0x16f   :  { %v120_v35 = vmul.f32 %v542_v33, %v104_v12  ;;  %v131_v38 = vadd.f32 %v423_v36, %v125_v34 }
 0x171   :  { %v126_v37 = vmul.f32 %v422_v32, %v120_v35 }
 0x173   :  { %v132_v39 = vadd.f32 %v423_v36, %v126_v37 }
 0x175   :  { %v450_v40 = vpack.c.bf16 %v132_v39, %v131_v38 }
 0x177   :  { %451 = vst [vmem:[#allocation2] sm:$0xff] %v450_v40  }
 0x17e   :  { %v530_v41 = vld [vmem:[#allocation2] sm:$0xff]  }
 0x17f   :  { %487 = vmatmul.mubr.bf16.vlgmr.msra.gmra.mxu0 %v530_v41 }
 0x23f   :  { %v256_v50 = vpop.f32.mrf.mxu0 }
 0x240   :  { %v257_v51 = vadd.f32 %v426_v49, %v256_v50 }
 0x241   :  { %v488_v52 = vpop.f32.mrf.mxu0 }
 0x242   :  { %v265_v53 = vmul.f32 0.70710677, %v257_v51  ;;  %v263_v61 = vmul.f32 0.5, %v257_v51 }
 0x243   :  { %v259_v54 = vpop.f32.mrf.mxu0 }
 0x244   :  { %543 = verf.f32 %v265_v53  ;;  %v260_v55 = vadd.f32 %v426_v49, %v259_v54 }
 0x245   :  { %v489_v56 = vpop.f32.mrf.mxu0 }
 0x246   :  { %v266_v57 = vmul.f32 0.70710677, %v260_v55  ;;  %v264_v62 = vmul.f32 0.5, %v260_v55 }
 0x248   :  { %545 = verf.f32 %v266_v57 }
 0x251   :  { %v544_v58 = vpop.eup %543 }
 0x252   :  { %v269_v59 = vadd.f32 1.0, %v544_v58 }
 0x254   :  { %v271_v2 = vmul.f32 %v269_v59, %v263_v61 }
 0x255   :  { %v546_v60 = vpop.eup %545 }
 0x256   :  { %v270_v63 = vadd.f32 1.0, %v546_v60 }
 0x258   :  { %v272_v3 = vmul.f32 %v270_v63, %v264_v62 }
 0x25a   :  { %v275_v4 = vpack.c.bf16 %v272_v3, %v271_v2 }
 0x25c   :  { %507 = vmatmul.mubr.bf16.vlgmr.msra.gmra.mxu1 %v275_v4 }
 0x31c   :  { %v374_v5 = vpop.f32.mrf.mxu1 }
 0x31d   :  { %v393_v7 = vadd.f32 %v374_v5, %v741_v0 }
 0x31e   :  { %v508_v8 = vpop.f32.mrf.mxu1 }
 0x31f   :  { %v399_v9 = vadd.f32 %v444_v6, %v393_v7 }
 0x320   :  { %v377_v10 = vpop.f32.mrf.mxu1 }
 0x321   :  { %401 = vst [vmem:[#allocation13] sm:$0xff] %v399_v9  ;;  %v394_v11 = vadd.f32 %v377_v10, %v743_v1 }
 0x322   :  { %v509_v12 = vpop.f32.mrf.mxu1 }
 0x323   :  { %v400_v13 = vadd.f32 %v444_v6, %v394_v11 }
 0x325   :  { %402 = vst [vmem:[#allocation13 + $0x8] sm:$0xff] %v400_v13 }
 0x326   :  { %658 = shalt.err (!%p655_p1)
}
 0x327   :  { %414 = dma.vmem_to_hbm [thread:$0]  %s409_s4, 256, %s780_s5, [#allocation6], %s680_s7, %s680_s7, %s681_s8  }
 0x328   :  { %673 = dma.done.wait [#allocation6], 256  }
 0x329   :  { %674 = vsyncadd [#allocation6], 4294967040 }
 0x32a   :  { %418 = vsyncpa [#allocation5], 1 }
 0x32b   :  { %419 = vsyncpa [#allocation8], 1 }
 0x32c   :  { %420 = vsyncpa [#allocation11], 1 }
 0x32d   :  { %421 = vsyncpa [#allocation6], 1 }

</bundles_post_ra>
